<compile_context>
chip_gen: v7x
topology: tpu7x:2x2x1
jax: 0.10.0
libtpu: 0.0.40
codegen_flags: <defaults>
</compile_context>

<pallas_src>
import math

import jax
import jax.numpy as jnp
from jax.experimental import pallas as pl
from jax.experimental.pallas import tpu as pltpu


def _build_pe_table(d_model: int, max_len: int, dtype=jnp.float32) -> jnp.ndarray:
    """Sinusoidal table, identical math to the PyTorch __init__ (even d_model)."""
    assert d_model % 2 == 0, "interleaved sin/cos assumes an even d_model"
    position = jnp.arange(0, max_len, dtype=jnp.float32)[:, None]              # (L, 1)
    # NOTE: log(1000.0) matches the quoted source module (not the canonical 10000.0).
    div_term = jnp.exp(
        jnp.arange(0, d_model, 2, dtype=jnp.float32) * -(math.log(1000.0) / d_model)
    )                                                                           # (D/2,)
    angles = position * div_term                                                # (L, D/2)
    pe = jnp.stack([jnp.sin(angles), jnp.cos(angles)], axis=-1).reshape(max_len, d_model)
    return pe.astype(dtype)


def _pe_add_kernel(x_ref, pe_ref, o_ref):
    """o = x + pe with pe broadcast over the row axis of the tile.

    x_ref/o_ref: (tr, tc).  pe_ref: (kr, tc) with kr in {1, align, tr}; rows of
    the x tile cycle through the kr pe rows (tile start is a multiple of kr).
    """
    tr = x_ref.shape[0]
    kr = pe_ref.shape[0]
    if kr == tr or kr == 1:
        # Same shape, or native (1, tc) -> (tr, tc) row-broadcast add.
        o_ref[...] = x_ref[...] + pe_ref[...]
    else:
        # kr == sublane alignment: replicate whole sublane tiles (layout-clean).
        reps = tr // kr
        pe_full = jnp.concatenate([pe_ref[...]] * reps, axis=0)
        o_ref[...] = x_ref[...] + pe_full


def positional_encoding_forward(
    x: jnp.ndarray, pe: jnp.ndarray, *, force_pallas: bool = False
) -> jnp.ndarray:
    """Eval-mode forward of PositionalEncoding: x + pe[None, :S, :].

    x: (B, S, D), pe: (max_len, D) with max_len >= S.
    """
    B, S, D = x.shape
    SD = S * D
    dtype = x.dtype
    itemsize = jnp.dtype(dtype).itemsize

    pe_s = pe[:S, :].astype(dtype)                                              # (S, D)

    ROW_TARGET = 512             # rows per tile (sublane axis)
    LANE_TARGET = 2048           # lanes per tile; 512 x 2048 f32 = 4 MiB / buffer
    align = max(8, 32 // itemsize)    # sublane alignment: 8 f32, 16 bf16, 32 int8/fp8

    # Tiny inputs: a standalone kernel is pure launch overhead; let XLA fuse it.
    if not force_pallas and B * SD <= ROW_TARGET * LANE_TARGET:
        return x + pe_s[None, :, :]

    # Small-batch row folding: fold k = align rows of the flattened (S*D) axis
    # into the batch/row axis so VMEM tiles are dense (align, 128) blocks.
    k = 1
    if B < align and SD % (align * 128) == 0:
        k = align
    R, L = B * k, SD // k

    x2 = x.reshape(R, L)
    pe2 = pe_s.reshape(k, L)

    # Row tile: full R when small (R = B*k is a multiple of k by construction),
    # else the largest align-multiple <= ROW_TARGET.  Lane tile: largest
    # 128-multiple <= LANE_TARGET, or the full lane extent.
    tr = R if R <= ROW_TARGET else (ROW_TARGET // align) * align
    tc = L if L <= LANE_TARGET else (LANE_TARGET // 128) * 128

    # Grid: lanes outer, rows inner -> pe block index (0, j) is constant across
    # consecutive steps, so its re-DMA is elided between row steps.
    grid = (pl.cdiv(L, tc), pl.cdiv(R, tr))

    # Double-buffered x-in + out + (tiny) pe, plus headroom; floored at 16 MiB,
    # capped well under v7x's 64 MiB physical VMEM.
    vmem_need = (4 * tr * tc + 2 * k * tc) * itemsize
    vmem_limit = min(max(int(vmem_need * 1.5) + (2 << 20), 16 << 20), 48 << 20)

    cost = pl.CostEstimate(
        flops=B * SD,
        transcendentals=0,
        bytes_accessed=(2 * B * SD + SD) * itemsize,
    )

    out2 = pl.pallas_call(
        _pe_add_kernel,
        out_shape=jax.ShapeDtypeStruct((R, L), dtype),
        grid_spec=pltpu.PrefetchScalarGridSpec(
            num_scalar_prefetch=0,
            grid=grid,
            in_specs=[
                pl.BlockSpec((tr, tc), lambda j, i: (i, j)),   # activations
                pl.BlockSpec((k, tc), lambda j, i: (0, j)),    # pe (row-resident)
            ],
            out_specs=pl.BlockSpec((tr, tc), lambda j, i: (i, j)),
        ),
        compiler_params=pltpu.CompilerParams(
            # Elementwise: both grid axes independent -> shard across v7x's 2 TCs.
            dimension_semantics=("parallel", "parallel"),
            vmem_limit_bytes=vmem_limit,
        ),
        cost_estimate=cost,
    )(x2, pe2)

    return out2.reshape(B, S, D)


if __name__ == "__main__":
    MAX_LEN = 64
    key = jax.random.PRNGKey(0)

    # Case 1: module-consistent tiny shape (batch=2, seq=8, d_model=32).
    D1, B1, S1 = 32, 2, 8
    pe1 = _build_pe_table(d_model=D1, max_len=MAX_LEN)
    key, sub = jax.random.split(key)
    x1 = jax.random.normal(sub, (B1, S1, D1), dtype=jnp.float32)
    out1 = jax.block_until_ready(positional_encoding_forward(x1, pe1, force_pallas=True))
    ref1 = x1 + pe1[None, :S1, :]
    assert out1.shape == (B1, S1, D1)
    assert jnp.allclose(out1, ref1, atol=1e-6), "case 1 mismatch vs reference"

    # Case 2: seq = max_len -> exercises the small-batch row-folding path (k=8).
    D2, B2, S2 = 32, 2, 64
    key, sub = jax.random.split(key)
    x2 = jax.random.normal(sub, (B2, S2, D2), dtype=jnp.float32)
    out2 = jax.block_until_ready(positional_encoding_forward(x2, pe1, force_pallas=True))
    ref2 = x2 + pe1[None, :S2, :]
    assert jnp.allclose(out2, ref2, atol=1e-6), "case 2 mismatch vs reference"

    # Case 3: wider d_model -> multi-lane-tile grid + pe reuse across row steps.
    D3, B3, S3 = 512, 2, 64
    pe3 = _build_pe_table(d_model=D3, max_len=MAX_LEN)
    key, sub = jax.random.split(key)
    x3 = jax.random.normal(sub, (B3, S3, D3), dtype=jnp.float32)
    out3 = jax.block_until_ready(positional_encoding_forward(x3, pe3, force_pallas=True))
    ref3 = x3 + pe3[None, :S3, :]
    assert jnp.allclose(out3, ref3, atol=1e-6), "case 3 mismatch vs reference"

    print("KERNEL_OK")
</pallas_src>

<mosaic_0001>
module attributes {stable_mosaic.version = 11 : i64} {
  func.func @_pe_add_kernel(%arg0: i32, %arg1: i32, %arg2: memref<2x256xf32, #tpu.memory_space<vmem>>, %arg3: memref<1x256xf32, #tpu.memory_space<vmem>>, %arg4: memref<2x256xf32, #tpu.memory_space<vmem>>) attributes {dimension_semantics = [#tpu.dimension_semantics<parallel>, #tpu.dimension_semantics<parallel>], iteration_bounds = array<i64: 1, 1>, scalar_prefetch = 0 : i64, scratch_operands = 0 : i64, tpu.core_type = #tpu.core_type<tc>, window_params = [{transform_indices = @transform_0, window_bounds = array<i64: 2, 256>}, {transform_indices = @transform_1, window_bounds = array<i64: 1, 256>}, {transform_indices = @transform_2, window_bounds = array<i64: 2, 256>}]} {
    %c0 = arith.constant 0 : index
    %c0_0 = arith.constant 0 : index
    %0 = vector.load %arg2[%c0, %c0_0] : memref<2x256xf32, #tpu.memory_space<vmem>>, vector<2x256xf32>
    %c0_1 = arith.constant 0 : index
    %c0_2 = arith.constant 0 : index
    %1 = vector.load %arg3[%c0_1, %c0_2] : memref<1x256xf32, #tpu.memory_space<vmem>>, vector<1x256xf32>
    %2 = vector.broadcast %1 : vector<1x256xf32> to vector<2x256xf32>
    %3 = arith.addf %0, %2 : vector<2x256xf32>
    %c0_3 = arith.constant 0 : index
    %c0_4 = arith.constant 0 : index
    %4 = vector.load %arg4[%c0_3, %c0_4] : memref<2x256xf32, #tpu.memory_space<vmem>>, vector<2x256xf32>
    tpu.vector_store %arg4[%c0_3, %c0_4], %3 {strides = array<i32>} : memref<2x256xf32, #tpu.memory_space<vmem>>, vector<2x256xf32>,
    return
  }
  func.func @transform_0(%arg0: i32, %arg1: i32) -> (i32, i32) {
    %c0_i32 = arith.constant 0 : i32
    return %arg1, %arg0 : i32, i32
  }
  func.func @transform_1(%arg0: i32, %arg1: i32) -> (i32, i32) {
    %c0_i32 = arith.constant 0 : i32
    %c0_i32_0 = arith.constant 0 : i32
    return %c0_i32, %arg0 : i32, i32
  }
  func.func @transform_2(%arg0: i32, %arg1: i32) -> (i32, i32) {
    %c0_i32 = arith.constant 0 : i32
    return %arg1, %arg0 : i32, i32
  }
}

</mosaic_0001>

<bundles_post_ra>
// kernel: tpu_custom_call.1
= control target key start
LH: loop header
LB: loop body
LE: loop exit
PB: predicated region body
PF: predicated region fallthrough
CT: control target
= control target key end

     0   :  { %7 = vsyncpa [#allocation3], 0  ;;  %s157_s0 = inlined_call_operand.hbm [shape: f32[2,256], index: 0, kind: input, shape index: {}]   ;;  %s158_s1 = inlined_call_operand.vmem [shape: f32[1,256], index: 1, kind: input, shape index: {}]   ;;  %s159_s2 = inlined_call_operand.hbm [shape: f32[2,256], index: 2, kind: output, shape index: {}]  }
   0x1   :  { %8 = vsyncpa [#allocation4], 0  ;;  %s112_s9 = smov [#allocation2]   ;;  %s64_s13 = scalar_lea.hbm %s157_s0, 64 }
   0x2   :  { %s15_s10 = sshll.u32 %s112_s9, 4  ;;  %p65_p0 = scmp.ne.s32.totalorder %s157_s0, %s64_s13  ;;  %s16_s10 = int_to_ptr.vmem [resolvable:$true] %s15_s10 }
   0x3   :  { %p68_p1 = scmp.lt.u32.totalorder %s64_s13, %s157_s0 }
   0x5   :  { %p70_p2 = pnand %p68_p1, %p65_p0 }
   0x7   :  { %73 = shalt.err (!%p70_p2)
}
   0x8   :  { %s74_s18 = scalar_lea.vmem %s16_s10, 64  ;;  %p79_p4 = scmp.lt.s32.totalorder %s16_s10, %s16_s10 }
   0x9   :  { %p75_p3 = scmp.ne.s32.totalorder %s16_s10, %s74_s18  ;;  %p80_p5 = scmp.lt.s32.totalorder %s74_s18, %s74_s18 }
   0xb   :  { %p81_p6 = por %p80_p5, %p79_p4 }
   0xd   :  { %p82_p7 = pnand %p81_p6, %p75_p3 }
   0xf   :  { %85 = shalt.err (!%p82_p7)
}
  0x10   :  { %18 = dma.hbm_to_vmem [thread:$0]  %s157_s0, 64, %s16_s10, [#allocation3]  }
  0x11   :  { %108 = dma.done.wait [#allocation3], 64  }
  0x12   :  { %109 = vsyncadd [#allocation3], 4294967232  ;;  %v27_v0 = vlaneseq  ;;  %v113_v1 = vmov 1983009808   ;;  %v25_v7 = vld [vmem:[%s158_s1] sm:$0x3] }
  0x13   :  { %v37_v2 = vunpack.c.l.s4 %v113_v1  ;;  %v24_v12 = vld [vmem:[#allocation2] sm:$0xf]  ;;  %s114_s23 = smov [#allocation5]  }
  0x14   :  { %v28_v3 = vshrl.u32 %v27_v0, 7  ;;  %s52_s0 = sshll.u32 %s114_s23, 4  ;;  %s53_s0 = int_to_ptr.vmem [resolvable:$true] %s52_s0 }
  0x15   :  { %v38_v6 = vunpack.c.0.s8 %v37_v2  ;;  %s86_s24 = scalar_lea.vmem %s53_s0, 64  ;;  %p91_p9 = scmp.lt.s32.totalorder %s53_s0, %s53_s0 }
  0x16   :  { %v29_v4 = vsub.s32 0, %v28_v3  ;;  %v33_v5 = vsub.s32 1, %v28_v3  ;;  %p87_p8 = scmp.ne.s32.totalorder %s53_s0, %s86_s24  ;;  %p92_p10 = scmp.lt.s32.totalorder %s86_s24, %s86_s24 }
  0x17   :  { %v41_v10 = vsub.s32 %v38_v6, %v28_v3 }
  0x18   :  { %v30_v8 = vrot.slane %v25_v7, %v29_v4  ;;  %v34_v9 = vrot.slane %v25_v7, %v33_v5  ;;  %p93_p11 = por %p92_p10, %p91_p9 }
  0x1a   :  { %v35_v11 = vcombine.low %v30_v8, %v34_v9  ;;  %p94_p12 = pnand %p93_p11, %p87_p8 }
  0x1c   :  { %v42_v13 = vrot.slane %v35_v11, %v41_v10 }
  0x1e   :  { %v44_v14 = vadd.f32 %v42_v13, %v24_v12 }
  0x20   :  { %45 = vst [vmem:[#allocation5] sm:$0xf] %v44_v14 }
  0x21   :  { %97 = shalt.err (!%p94_p12)
}
  0x22   :  { %s98_s26 = scalar_lea.hbm %s159_s2, 64 }
  0x23   :  { %p99_p13 = scmp.ne.s32.totalorder %s159_s2, %s98_s26  ;;  %p102_p0 = scmp.lt.u32.totalorder %s98_s26, %s159_s2 }
  0x25   :  { %p104_p1 = pnand %p102_p0, %p99_p13 }
  0x27   :  { %107 = shalt.err (!%p104_p1)
}
  0x28   :  { %55 = dma.vmem_to_hbm [thread:$0]  %s53_s0, 64, %s159_s2, [#allocation4]  }
  0x29   :  { %110 = dma.done.wait [#allocation4], 64  }
  0x2a   :  { %111 = vsyncadd [#allocation4], 4294967232 }
  0x2b   :  { %59 = vsyncpa [#allocation3], 1 }
  0x2c   :  { %60 = vsyncpa [#allocation4], 1 }

</bundles_post_ra>
